<compile_context>
chip_gen: v7x
topology: tpu7x:2x2x1
jax: 0.10.0
libtpu: 0.0.40
codegen_flags: <defaults>
</compile_context>

<pallas_src>
import math

import jax
import jax.numpy as jnp
from jax import lax
from jax.experimental import pallas as pl
from jax.experimental.pallas import tpu as pltpu


_LANE = 128
_BLOCK_BUDGET_BYTES = 2 * 1024 * 1024    # per-block target; ~4x with double buffering
_VMEM_LIMIT_BYTES = 32 * 1024 * 1024     # raise v5e's 16 MiB default; safe on v6e/v7x


def _sublane_mult(dtype):
    item = jnp.dtype(dtype).itemsize
    return max(8, 32 // max(item, 1))    # 8 for f32, 16 for bf16, 32 for int8


def _squeeze_and_coalesce(shape, order):
    """Drop unit dims and merge input dims that stay adjacent & in-order in the output."""
    nz = [d for d in range(len(shape)) if shape[d] != 1]
    renum = {d: i for i, d in enumerate(nz)}
    shp = [shape[d] for d in nz]
    ordr = [renum[d] for d in order if shape[d] != 1]
    groups = []
    for d in ordr:
        if groups and d == groups[-1][-1] + 1:
            groups[-1].append(d)
        else:
            groups.append([d])
    groups_in = sorted(groups, key=lambda g: g[0])
    gid = {g[0]: i for i, g in enumerate(groups_in)}
    cs = tuple(math.prod(shp[d] for d in g) for g in groups_in)
    cp = tuple(gid[g[0]] for g in groups)
    return cs, cp


def _fit_tiles(sizes, aligns, itemsize, budget):
    """Shrink (in priority order) to aligned tiles so prod(tiles)*itemsize <= budget."""
    tiles = list(sizes)
    for i in range(len(tiles)):
        if math.prod(tiles) * itemsize <= budget:
            break
        others = max(1, math.prod(tiles) // tiles[i])
        max_e = max(1, budget // (itemsize * others))
        a = aligns[i]
        t = max(a, (max_e // a) * a)
        tiles[i] = min(sizes[i], t)
    return tiles


def _largest_divisor(n, cap):
    cap = max(1, min(n, cap))
    for c in range(cap, 0, -1):
        if n % c == 0:
            return c
    return 1


def _hot_permute(x, p):
    """Permutation whose (coalesced) form keeps the input's last (lane) dim within
    the output's last two dims.  Kernel is a plain copy loop or a 2-D minor transpose."""
    m = x.ndim
    s = x.shape
    item = jnp.dtype(x.dtype).itemsize
    sub = _sublane_mult(x.dtype)
    out_shape = tuple(s[d] for d in p)
    swap = (p[-2] == m - 1)            # input lane dim becomes output second-minor -> transpose
    blk = [1] * m                      # block size per INPUT dim

    if swap:
        a = p[-1]                      # input dim that becomes the output minor
        if s[a] * s[m - 1] * item <= _BLOCK_BUDGET_BYTES:
            blk[a], blk[m - 1] = s[a], s[m - 1]
        else:
            t = max(_LANE, (math.isqrt(_BLOCK_BUDGET_BYTES // item) // _LANE) * _LANE)
            blk[a] = min(s[a], t)
            blk[m - 1] = min(s[m - 1], t)
        rows, cols = blk[a], blk[m - 1]
        # TODO(synk): fold leading batch dims into the transpose tile (needs a batched
        # in-kernel transpose); currently only the 2-D minor plane is blocked/tiled.

        def kernel(x_ref, o_ref):
            v = x_ref[...].reshape(rows, cols)
            o_ref[...] = v.T.reshape(o_ref.shape)

    else:
        b = p[-2]                      # input dim that becomes the output second-minor
        loop_dim = m - 2               # input second-minor dim; relocated to a leading output dim
        base = s[b] * s[m - 2] * s[m - 1] * item
        if base <= _BLOCK_BUDGET_BYTES:
            blk[b], blk[m - 2], blk[m - 1] = s[b], s[m - 2], s[m - 1]
            cur = base
            lo = b
            for k in range(3, m + 1):  # greedily fold more leading output dims (pure batch)
                d = p[-k]
                if d == m - 2:
                    continue           # already included (it is the in-kernel loop dim)
                if d >= lo:
                    break              # folding it would break the copy-order invariant
                if cur * s[d] <= _BLOCK_BUDGET_BYTES:
                    blk[d] = s[d]
                    cur *= s[d]
                    lo = d
                else:
                    c = _largest_divisor(s[d], _BLOCK_BUDGET_BYTES // cur)
                    if c > 1:
                        blk[d] = c
                    break
        else:
            blk[b], blk[m - 2], blk[m - 1] = _fit_tiles(
                [s[b], s[m - 2], s[m - 1]], [sub, sub, _LANE], item, _BLOCK_BUDGET_BYTES)

        q = p.index(m - 2)             # output position of the relocated input dim
        nloop = blk[m - 2]
        out_blk_shape = tuple(blk[p[k]] for k in range(m))
        slab_shape = tuple(1 if k == q else out_blk_shape[k] for k in range(m))

        def kernel(x_ref, o_ref):
            def body(j, carry):
                src = tuple(pl.ds(j, 1) if d == loop_dim else slice(None)
                            for d in range(m))
                dst = tuple(pl.ds(j, 1) if k == q else slice(None)
                            for k in range(m))
                o_ref[dst] = x_ref[src].reshape(slab_shape)
                return carry
            lax.fori_loop(0, nloop, body, None)

    # One grid axis per output dim whose block does not cover the full dim,
    # ordered output-major (good writeback locality). Every block is written once.
    grid = []
    gpos = {}
    for k in range(m):
        d = p[k]
        if blk[d] < s[d]:
            gpos[d] = len(grid)
            grid.append(pl.cdiv(s[d], blk[d]))
    if not grid:
        grid = [1]

    def in_index(*g):
        return tuple(g[gpos[d]] if d in gpos else 0 for d in range(m))

    def out_index(*g):
        return tuple(g[gpos[p[k]]] if p[k] in gpos else 0 for k in range(m))

    return pl.pallas_call(
        kernel,
        out_shape=jax.ShapeDtypeStruct(out_shape, x.dtype),
        grid=tuple(grid),
        in_specs=[pl.BlockSpec(tuple(blk), in_index)],
        out_specs=pl.BlockSpec(tuple(blk[p[k]] for k in range(m)), out_index),
        compiler_params=pltpu.CompilerParams(
            dimension_semantics=("parallel",) * len(grid),
            vmem_limit_bytes=_VMEM_LIMIT_BYTES),
        cost_estimate=pl.CostEstimate(
            flops=0, transcendentals=0, bytes_accessed=2 * x.size * item),
    )(x)


def pallas_permute(x, order):
    order = tuple(int(d) for d in order)
    n = x.ndim
    assert sorted(order) == list(range(n)), "order must be a permutation of the dims"
    if order == tuple(range(n)):
        return x                                   # identity: no data movement
    out_shape = tuple(x.shape[d] for d in order)

    cs, cp = _squeeze_and_coalesce(x.shape, order)
    m = len(cs)
    if m <= 1 or cp == tuple(range(m)):
        return jnp.reshape(x, out_shape)           # pure relabeling of unit/merged dims

    xc = jnp.reshape(x, cs)
    if (m - 1) in (cp[-1], cp[-2]):
        yc = _hot_permute(xc, cp)
    else:
        # The input's lane dim moves to an outer output position: do it in two
        # hot-path Pallas passes (bring the final minor dim last, then finish).
        t = cp[-1]
        rest = tuple(d for d in range(m) if d not in (t, m - 1))
        q1 = rest + (m - 1, t)
        inv = [0] * m
        for i, d in enumerate(q1):
            inv[d] = i
        q2 = tuple(inv[d] for d in cp)
        yc = pallas_permute(pallas_permute(xc, q1), q2)
    return jnp.reshape(yc, out_shape)


if __name__ == "__main__":
    key = jax.random.PRNGKey(0)
    x = jax.random.normal(key, (2, 4, 16, 16), dtype=jnp.float32)  # NCHW

    orders = [
        (0, 1, 2, 3),   # identity (short-circuit)
        (1, 0, 2, 3),   # leading-dim remap -> lane-dense (256-wide) copy blocks
        (0, 1, 3, 2),   # minor H/W transpose (coalesced batch gridded)
        (1, 0, 3, 2),   # leading remap + minor transpose
        (2, 3, 0, 1),   # coalesces to a single 2-D transpose, one grid step
        (0, 2, 3, 1),   # NCHW -> NHWC (coalesced minor transpose)
        (3, 2, 1, 0),   # full reversal (two-pass hot-path decomposition)
    ]
    for order in orders:
        y = pallas_permute(x, order)
        jax.block_until_ready(y)
        ref = jnp.transpose(x, order)
        assert y.shape == ref.shape and y.dtype == ref.dtype, (order, y.shape)
        assert bool(jnp.array_equal(y, ref)), f"mismatch for order={order}"

    print("KERNEL_OK")
</pallas_src>

<mosaic_0001>
module attributes {stable_mosaic.version = 11 : i64} {
  func.func @kernel(%arg0: i32, %arg1: memref<2x4x256xf32, #tpu.memory_space<vmem>>, %arg2: memref<4x2x256xf32, #tpu.memory_space<vmem>>) attributes {dimension_semantics = [#tpu.dimension_semantics<parallel>], iteration_bounds = array<i64: 1>, scalar_prefetch = 0 : i64, scratch_operands = 0 : i64, tpu.core_type = #tpu.core_type<tc>, window_params = [{pipeline_mode = #tpu.pipeline_mode<synchronous>, transform_indices = @transform_0, window_bounds = array<i64: 2, 4, 256>}, {pipeline_mode = #tpu.pipeline_mode<synchronous>, transform_indices = @transform_1, window_bounds = array<i64: 4, 2, 256>}]} {
    %c0_i32 = arith.constant 0 : i32
    %c4_i32 = arith.constant 4 : i32
    %0 = arith.addi %c0_i32, %c4_i32 : i32
    %c1_i32 = arith.constant 1 : i32
    scf.for %arg3 = %c0_i32 to %0 step %c1_i32  : i32 {
      %c0 = arith.constant 0 : index
      %1 = arith.index_cast %arg3 : i32 to index
      %c0_1 = arith.constant 0 : index
      %2 = vector.load %arg1[%c0, %1, %c0_1] : memref<2x4x256xf32, #tpu.memory_space<vmem>>, vector<2x1x256xf32>
      %3 = vector.shape_cast %2 : vector<2x1x256xf32> to vector<1x2x256xf32>
      %4 = arith.index_cast %arg3 : i32 to index
      %c0_2 = arith.constant 0 : index
      %c0_3 = arith.constant 0 : index
      %5 = vector.load %arg2[%4, %c0_2, %c0_3] : memref<4x2x256xf32, #tpu.memory_space<vmem>>, vector<1x2x256xf32>
      tpu.vector_store %arg2[%4, %c0_2, %c0_3], %3 {strides = array<i32>} : memref<4x2x256xf32, #tpu.memory_space<vmem>>, vector<1x2x256xf32>,
    }
    %c4_i32_0 = arith.constant 4 : i32
    return
  }
  func.func @transform_0(%arg0: i32) -> (i32, i32, i32) {
    %c0_i32 = arith.constant 0 : i32
    %c0_i32_0 = arith.constant 0 : i32
    %c0_i32_1 = arith.constant 0 : i32
    %c0_i32_2 = arith.constant 0 : i32
    return %c0_i32, %c0_i32_0, %c0_i32_1 : i32, i32, i32
  }
  func.func @transform_1(%arg0: i32) -> (i32, i32, i32) {
    %c0_i32 = arith.constant 0 : i32
    %c0_i32_0 = arith.constant 0 : i32
    %c0_i32_1 = arith.constant 0 : i32
    %c0_i32_2 = arith.constant 0 : i32
    return %c0_i32, %c0_i32_0, %c0_i32_1 : i32, i32, i32
  }
}

</mosaic_0001>

<bundles_post_ra>
// kernel: tpu_custom_call.1
= control target key start
LH: loop header
LB: loop body
LE: loop exit
PB: predicated region body
PF: predicated region fallthrough
CT: control target
= control target key end

     0   :  { %6 = vsyncpa [#allocation3], 0  ;;  %s206_s0 = inlined_call_operand.hbm [shape: f32[2,4,256], index: 0, kind: input, shape index: {}]   ;;  %s207_s1 = inlined_call_operand.hbm [shape: f32[4,2,256], index: 1, kind: output, shape index: {}]  }
   0x1   :  { %7 = vsyncpa [#allocation4], 0  ;;  %s166_s6 = smov [#allocation2]   ;;  %s110_s10 = scalar_lea.hbm %s206_s0, 256 }
   0x2   :  { %s13_s7 = sshll.u32 %s166_s6, 4  ;;  %p111_p0 = scmp.ne.s32.totalorder %s206_s0, %s110_s10  ;;  %s14_s7 = int_to_ptr.vmem [resolvable:$true] %s13_s7 }
   0x3   :  { %p114_p1 = scmp.lt.u32.totalorder %s110_s10, %s206_s0 }
   0x5   :  { %p116_p2 = pnand %p114_p1, %p111_p0 }
   0x7   :  { %119 = shalt.err (!%p116_p2)
}
   0x8   :  { %s120_s15 = scalar_lea.vmem %s14_s7, 256  ;;  %p125_p4 = scmp.lt.s32.totalorder %s14_s7, %s14_s7 }
   0x9   :  { %p121_p3 = scmp.ne.s32.totalorder %s14_s7, %s120_s15  ;;  %p126_p5 = scmp.lt.s32.totalorder %s120_s15, %s120_s15 }
   0xb   :  { %p127_p6 = por %p126_p5, %p125_p4 }
   0xd   :  { %p128_p7 = pnand %p127_p6, %p121_p3 }
   0xf   :  { %131 = shalt.err (!%p128_p7)
}
  0x10   :  { %s167_s16 = smov 128   ;;  %s168_s17 = smov 8  }
  0x11   :  { %19 = dma.hbm_to_vmem [thread:$0]  %s206_s0, 256, %s14_s7, [#allocation3], %s167_s16, %s167_s16, %s168_s17  }
  0x12   :  { %158 = dma.done.wait [#allocation3], 256  }
  0x13   :  { %159 = vsyncadd [#allocation3], 4294967040  ;;  %s162_s20 = smov 0  }
  0x14 LB: > { %s29_s21 = sshra.s32 %s164_s20, 2  ;;  %s32_s22 = sand.u32 3, %s164_s20  ;;  %s164_s20 = sphi %s162_s20, %s28_s20  }
  0x15   : > { %s94_s23 = sshll.u32 %s29_s21, 3  ;;  %s95_s24 = sshll.u32 %s164_s20, 2 }
  0x16   : > { %s35_s25 = sadd.s32 %s94_s23, %s32_s22  ;;  %s54_s27 = scalar_lea.vmem [#allocation5], %s95_s24 }
  0x17   : > { %s36_s26 = scalar_lea.vmem [#allocation2], %s35_s25  ;;  %s28_s20 = sadd.s32 1, %s164_s20  }
  0x18   : > { %v37_v0 = vld [vmem:[%s36_s26] ss:$4 sm:$0x3]  ;;  %v90_v1 = vld [vmem:[%s36_s26 + $0x8] ss:$4 sm:$0x3] }
  0x19   : > { %v43_v2 = vcombine.low %v37_v0, %v90_v1  ;;  %p25_p8 = scmp.ge.s32.totalorder %s28_s20, 4  }
  0x1a   :  { %s169_s0 = smov (%p25_p8), [#allocation5]  }
  0x1b   : > { %93 = vst.sshfl [vmem:[%s54_s27] sm:$0x33 pattern:$0x75316420] %v43_v2  ;;  %27 = sbr.rel (!%p25_p8) target bundleno = 20 (0x14), region = 38  ;;  %s61_s28 = sshll.u32 (%p25_p8), %s169_s0, 4  ;;  %s62_s28 = int_to_ptr.vmem [resolvable:$true] %s61_s28 }
  0x1c   :  { %s132_s29 = scalar_lea.vmem (%p25_p8), %s62_s28, 256  ;;  %p137_p10 = scmp.lt.s32.totalorder (%p25_p8), %s62_s28, %s62_s28 }
  0x1d   :  { %p133_p9 = scmp.ne.s32.totalorder (%p25_p8), %s62_s28, %s132_s29  ;;  %p138_p11 = scmp.lt.s32.totalorder (%p25_p8), %s132_s29, %s132_s29 }
  0x1f   :  { %p139_p12 = por (%p25_p8), %p138_p11, %p137_p10 }
  0x21   :  { %p140_p13 = pnand (%p25_p8), %p139_p12, %p133_p9 }
  0x23   :  { %143 = shalt.err (!%p140_p13)
}
  0x24   :  { %s144_s3 = scalar_lea.hbm %s207_s1, 256 }
  0x25   :  { %p145_p0 = scmp.ne.s32.totalorder %s207_s1, %s144_s3  ;;  %p148_p1 = scmp.lt.u32.totalorder %s144_s3, %s207_s1 }
  0x27   :  { %p150_p2 = pnand %p148_p1, %p145_p0 }
  0x29   :  { %153 = shalt.err (!%p150_p2)
}
  0x2a   :  { %s170_s8 = smov 64   ;;  %s171_s9 = smov 4  }
  0x2b   :  { %67 = dma.vmem_to_hbm [thread:$0]  %s62_s28, 256, %s207_s1, [#allocation4], %s170_s8, %s170_s8, %s171_s9  }
  0x2c   :  { %160 = dma.done.wait [#allocation4], 256  }
  0x2d   :  { %161 = vsyncadd [#allocation4], 4294967040 }
  0x2e   :  { %71 = vsyncpa [#allocation3], 1 }
  0x2f   :  { %72 = vsyncpa [#allocation4], 1 }

</bundles_post_ra>
